<compile_context>
chip_gen: v5e
topology: v5e:2x2
jax: 0.10.0
libtpu: 0.0.40
codegen_flags: <defaults>
</compile_context>

<pallas_src>
import functools

import jax
import jax.numpy as jnp
from jax.experimental import pallas as pl
from jax.experimental.pallas import tpu as pltpu

LANE = 128      # lane width (last dim)
MAX_SUB = 2048  # rows per grid step: 2048 x 128 x f32 = 1 MiB per input buffer


def _bce_sum_kernel(x_ref, t_ref, out_ref, *, sub, steps, rem_rows):
    """Accumulate sum of BCE-with-logits losses into the resident (8,128) out."""
    i = pl.program_id(0)

    @pl.when(i == 0)
    def _():
        out_ref[...] = jnp.zeros_like(out_ref)

    # Native-dtype HBM reads; widen in-vreg.
    x = x_ref[...].astype(jnp.float32)
    t = t_ref[...].astype(jnp.float32)

    # Numerically-stable BCE with logits (PyTorch formula):
    #   loss = max(x, 0) - x*t + log1p(exp(-|x|))
    loss = jnp.maximum(x, 0.0) - x * t + jnp.log1p(jnp.exp(-jnp.abs(x)))

    def accumulate(v):
        # Fold (sub, 128) onto the (8, 128) accumulator with tile-preserving
        # reshape + pure VPU adds (no XLU reduce on the loop-carried path).
        if sub % 8 == 0:
            out_ref[...] += v.reshape(sub // 8, 8, LANE).sum(axis=0)
        else:
            out_ref[0:1, :] += jnp.sum(v, axis=0, keepdims=True)

    if rem_rows == 0:
        # Bulk path: every block is full -> completely mask-free.
        accumulate(loss)
    else:
        # Only the final block is ragged; all earlier blocks stay mask-free.
        @pl.when(i < steps - 1)
        def _():
            accumulate(loss)

        @pl.when(i == steps - 1)
        def _():
            # rem_rows is a static Python int -> this mask is a constant.
            row_i = jax.lax.broadcasted_iota(jnp.int32, (sub, LANE), 0)
            accumulate(jnp.where(row_i < rem_rows, loss, 0.0))


def bce_with_logits_loss(outputs, targets):
    """Mean-reduced BCEWithLogitsLoss; elementwise + sum hot path in Pallas."""
    assert outputs.shape == targets.shape
    n = outputs.size

    x_flat = outputs.reshape(-1)   # free reshape, keep native dtype
    t_flat = targets.reshape(-1)

    rows = n // LANE
    rem = n % LANE

    # <=127 trailing elements (only when numel % 128 != 0): sum them in plain
    # JAX instead of padding/copying the whole tensor.
    if rem:
        xt = x_flat[rows * LANE:].astype(jnp.float32)
        tt = t_flat[rows * LANE:].astype(jnp.float32)
        tail_sum = jnp.sum(
            jnp.maximum(xt, 0.0) - xt * tt + jnp.log1p(jnp.exp(-jnp.abs(xt))))
    else:
        tail_sum = jnp.float32(0.0)

    if rows == 0:
        return tail_sum / jnp.float32(n)

    if rem:
        # Aligned bulk view (slice only needed in the non-divisible case).
        x2 = x_flat[: rows * LANE].reshape(rows, LANE)
        t2 = t_flat[: rows * LANE].reshape(rows, LANE)
    else:
        x2 = x_flat.reshape(rows, LANE)
        t2 = t_flat.reshape(rows, LANE)

    # Big blocks: the whole array when it fits, else MAX_SUB rows per step.
    sub = rows if rows <= MAX_SUB else MAX_SUB
    steps = pl.cdiv(rows, sub)
    rem_rows = rows % sub  # 0 -> fully mask-free kernel

    kernel = functools.partial(_bce_sum_kernel, sub=sub, steps=steps,
                               rem_rows=rem_rows)

    partials = pl.pallas_call(
        kernel,
        out_shape=jax.ShapeDtypeStruct((8, LANE), jnp.float32),
        grid_spec=pltpu.PrefetchScalarGridSpec(
            num_scalar_prefetch=0,
            grid=(steps,),
            in_specs=[
                pl.BlockSpec((sub, LANE), lambda i: (i, 0)),
                pl.BlockSpec((sub, LANE), lambda i: (i, 0)),
            ],
            out_specs=pl.BlockSpec((8, LANE), lambda i: (0, 0)),
        ),
        compiler_params=pltpu.CompilerParams(
            dimension_semantics=("arbitrary",)),
    )(x2, t2)

    return (jnp.sum(partials) + tail_sum) / jnp.float32(n)


def _reference(outputs, targets):
    x = outputs.astype(jnp.float32)
    t = targets.astype(jnp.float32)
    loss = jnp.maximum(x, 0.0) - x * t + jnp.log1p(jnp.exp(-jnp.abs(x)))
    return jnp.mean(loss)


if __name__ == "__main__":
    key = jax.random.PRNGKey(0)
    k1, k2 = jax.random.split(key)
    outputs = jax.random.normal(k1, (2, 4, 16, 16), dtype=jnp.float32)
    targets = (jax.random.uniform(k2, (2, 4, 16, 16)) > 0.5).astype(jnp.float32)

    loss = bce_with_logits_loss(outputs, targets)
    jax.block_until_ready(loss)

    ref = _reference(outputs, targets)
    assert jnp.allclose(loss, ref, atol=1e-5, rtol=1e-5), (loss, ref)
    print("KERNEL_OK")
</pallas_src>

<mosaic_0001>
module attributes {stable_mosaic.version = 11 : i64} {
  func.func @_bce_sum_kernel(%arg0: i32, %arg1: memref<16x128xf32, #tpu.memory_space<vmem>>, %arg2: memref<16x128xf32, #tpu.memory_space<vmem>>, %arg3: memref<8x128xf32, #tpu.memory_space<vmem>>) attributes {dimension_semantics = [#tpu.dimension_semantics<arbitrary>], iteration_bounds = array<i64: 1>, scalar_prefetch = 0 : i64, scratch_operands = 0 : i64, tpu.core_type = #tpu.core_type<tc>, window_params = [{transform_indices = @transform_0, window_bounds = array<i64: 16, 128>}, {transform_indices = @transform_1, window_bounds = array<i64: 16, 128>}, {pipeline_mode = #tpu.pipeline_mode<synchronous>, transform_indices = @transform_2, window_bounds = array<i64: 8, 128>}]} {
    %c0_i32 = arith.constant 0 : i32
    %0 = arith.cmpi eq, %arg0, %c0_i32 : i32
    %1 = arith.extui %0 : i1 to i32
    %c0_i32_0 = arith.constant 0 : i32
    %2 = arith.cmpi ne, %1, %c0_i32_0 : i32
    scf.if %2 {
      %cst_10 = arith.constant 0.000000e+00 : f32
      %20 = vector.broadcast %cst_10 : f32 to vector<8x128xf32>
      %c0_11 = arith.constant 0 : index
      %c0_12 = arith.constant 0 : index
      %21 = vector.load %arg3[%c0_11, %c0_12] : memref<8x128xf32, #tpu.memory_space<vmem>>, vector<8x128xf32>
      tpu.vector_store %arg3[%c0_11, %c0_12], %20 {strides = array<i32>} : memref<8x128xf32, #tpu.memory_space<vmem>>, vector<8x128xf32>,
    } else {
    }
    %c0 = arith.constant 0 : index
    %c0_1 = arith.constant 0 : index
    %3 = vector.load %arg1[%c0, %c0_1] : memref<16x128xf32, #tpu.memory_space<vmem>>, vector<16x128xf32>
    %c0_2 = arith.constant 0 : index
    %c0_3 = arith.constant 0 : index
    %4 = vector.load %arg2[%c0_2, %c0_3] : memref<16x128xf32, #tpu.memory_space<vmem>>, vector<16x128xf32>
    %cst = arith.constant 0.000000e+00 : f32
    %5 = vector.broadcast %cst : f32 to vector<16x128xf32>
    %6 = arith.maximumf %3, %5 : vector<16x128xf32>
    %7 = arith.mulf %3, %4 : vector<16x128xf32>
    %8 = arith.subf %6, %7 : vector<16x128xf32>
    %9 = math.absf %3 : vector<16x128xf32>
    %cst_4 = arith.constant 0.000000e+00 : f32
    %10 = vector.broadcast %cst_4 : f32 to vector<16x128xf32>
    %11 = arith.subf %10, %9 : vector<16x128xf32>
    %12 = math.exp %11 : vector<16x128xf32>
    %13 = math.log1p %12 : vector<16x128xf32>
    %14 = arith.addf %8, %13 : vector<16x128xf32>
    %c0_5 = arith.constant 0 : index
    %c0_6 = arith.constant 0 : index
    %15 = vector.load %arg3[%c0_5, %c0_6] : memref<8x128xf32, #tpu.memory_space<vmem>>, vector<8x128xf32>
    %16 = vector.shape_cast %14 : vector<16x128xf32> to vector<2x8x128xf32>
    %cst_7 = arith.constant dense<0.000000e+00> : vector<8x128xf32>
    %17 = vector.multi_reduction <add>, %16, %cst_7 [0] : vector<2x8x128xf32> to vector<8x128xf32>
    %18 = arith.addf %15, %17 : vector<8x128xf32>
    %c0_8 = arith.constant 0 : index
    %c0_9 = arith.constant 0 : index
    %19 = vector.load %arg3[%c0_8, %c0_9] : memref<8x128xf32, #tpu.memory_space<vmem>>, vector<8x128xf32>
    tpu.vector_store %arg3[%c0_8, %c0_9], %18 {strides = array<i32>} : memref<8x128xf32, #tpu.memory_space<vmem>>, vector<8x128xf32>,
    return
  }
  func.func @transform_0(%arg0: i32) -> (i32, i32) {
    %c0_i32 = arith.constant 0 : i32
    %c0_i32_0 = arith.constant 0 : i32
    return %arg0, %c0_i32 : i32, i32
  }
  func.func @transform_1(%arg0: i32) -> (i32, i32) {
    %c0_i32 = arith.constant 0 : i32
    %c0_i32_0 = arith.constant 0 : i32
    return %arg0, %c0_i32 : i32, i32
  }
  func.func @transform_2(%arg0: i32) -> (i32, i32) {
    %c0_i32 = arith.constant 0 : i32
    %c0_i32_0 = arith.constant 0 : i32
    %c0_i32_1 = arith.constant 0 : i32
    return %c0_i32, %c0_i32_0 : i32, i32
  }
}

</mosaic_0001>

<bundles_post_ra>
// kernel: tpu_custom_call.1
= control target key start
LH: loop header
LB: loop body
LE: loop exit
PB: predicated region body
PF: predicated region fallthrough
CT: control target
= control target key end

     0   :  { %7 = vsyncpa [#allocation3], 0  ;;  %s230_s0 = inlined_call_operand.hbm [shape: f32[16,128], index: 0, kind: input, shape index: {}]   ;;  %s231_s1 = inlined_call_operand.hbm [shape: f32[16,128], index: 1, kind: input, shape index: {}]   ;;  %s232_s2 = inlined_call_operand.hbm [shape: f32[8,128], index: 2, kind: output, shape index: {}]  }
   0x1   :  { %8 = vsyncpa [#allocation6], 0 }
   0x2   :  { %9 = vsyncpa [#allocation4], 0  ;;  %s14_s11 = sshll.u32 %s230_s0, 4  ;;  %s201_s12 = smov [#allocation2]   ;;  %s15_s11 = int_to_ptr.hbm [resolvable:$true] %s14_s11 }
   0x3   :  { %s16_s13 = sshll.u32 %s201_s12, 4  ;;  %s27_s16 = sshll.u32 %s231_s1, 4  ;;  %s17_s13 = int_to_ptr.vmem [resolvable:$true] %s16_s13  ;;  %s28_s16 = int_to_ptr.hbm [resolvable:$true] %s27_s16 }
   0x4   :  { %s202_s17 = smov 128   ;;  %s203_s18 = smov 8  }
   0x5   :  { %22 = dma.hbm_to_vmem [thread:$0]  %s15_s11, 256, %s17_s13, [#allocation3], %s202_s17, %s202_s17, %s203_s18  }
   0x6   :  { %s204_s19 = smov [#allocation5]  }
   0x7   :  { %s29_s20 = sshll.u32 %s204_s19, 4  ;;  %s30_s20 = int_to_ptr.vmem [resolvable:$true] %s29_s20 }
   0x8   :  { %35 = dma.hbm_to_vmem [thread:$0]  %s28_s16, 256, %s30_s20, [#allocation6], %s202_s17, %s202_s17, %s203_s18  }
   0x9   :  { %195 = dma.done.wait [#allocation3], 256  }
   0xa   :  { %196 = vsyncadd [#allocation3], 4294967040 }
   0xb   :  { %197 = dma.done.wait [#allocation6], 256  }
   0xc   :  { %198 = vsyncadd [#allocation6], 4294967040  ;;  %v49_v0 = vld [vmem:[#allocation2] sm:$0xff]  ;;  %v50_v1 = vld [vmem:[#allocation2 + $0x8] sm:$0xff]  ;;  %s205_s0 = smov [#allocation7]   ;;  %s98_s23 = sshll.u32 %s232_s2, 4  ;;  %s99_s23 = int_to_ptr.hbm [resolvable:$true] %s98_s23 }
   0xd   :  { %v59_v2 = vand.u32 2147483647, %v49_v0  ;;  %v60_v3 = vand.u32 2147483647, %v50_v1  ;;  %v51_v12 = vld [vmem:[#allocation5] sm:$0xff]  ;;  %v52_v15 = vld [vmem:[#allocation5 + $0x8] sm:$0xff] }
   0xe   :  { %v53_v17 = vmax.f32 %v49_v0, 0.0  ;;  %v55_v18 = vmul.f32 %v51_v12, %v49_v0  ;;  %v54_v21 = vmax.f32 %v50_v1, 0.0  ;;  %v56_v22 = vmul.f32 %v52_v15, %v50_v1  ;;  %s96_s1 = sshll.u32 %s205_s0, 4  ;;  %s97_s1 = int_to_ptr.vmem [resolvable:$true] %s96_s1 }
   0xf   :  { %v61_v4 = vsub.f32 0.0, %v59_v2  ;;  %v62_v5 = vsub.f32 0.0, %v60_v3 }
  0x10   :  { %v57_v26 = vsub.f32 %v53_v17, %v55_v18  ;;  %v58_v29 = vsub.f32 %v54_v21, %v56_v22 }
  0x11   :  { %v63_v6 = vmul.f32 1.442695, %v61_v4  ;;  %v65_v7 = vmul.f32 1.442695, %v62_v5 }
  0x13   :  { %115 = vpow2.f32 %v63_v6 }
  0x14   :  { %117 = vpow2.f32 %v65_v7 }
  0x19   :  { %v116_v8 = vpop.eup %115 }
  0x1a   :  { %v118_v9 = vpop.eup %117  ;;  %v67_v10 = vadd.f32 1.0, %v116_v8  ;;  %v70_v11 = vmul.f32 -0.5, %v116_v8  ;;  %v73_v19 = vand.u32 2147483647, %v116_v8 }
  0x1b   :  { %v76_v13 = vadd.f32 1.0, %v118_v9  ;;  %v79_v14 = vmul.f32 -0.5, %v118_v9  ;;  %v82_v23 = vand.u32 2147483647, %v118_v9 }
  0x1c   :  { %119 = vlog2.f32 %v67_v10  ;;  %v71_v16 = vadd.f32 1.0, %v70_v11  ;;  %vm74_vm0 = vcmp.lt.f32.partialorder %v73_v19, 0.0004427343 }
  0x1d   :  { %121 = vlog2.f32 %v76_v13  ;;  %v80_v20 = vadd.f32 1.0, %v79_v14  ;;  %vm83_vm1 = vcmp.lt.f32.partialorder %v82_v23, 0.0004427343 }
  0x1e   :  { %v72_v24 = vmul.f32 %v116_v8, %v71_v16 }
  0x1f   :  { %v81_v27 = vmul.f32 %v118_v9, %v80_v20 }
  0x22   :  { %v120_v25 = vpop.eup %119 }
  0x23   :  { %v122_v28 = vpop.eup %121  ;;  %v69_v30 = vmul.f32 0.6931472, %v120_v25 }
  0x24   :  { %v78_v31 = vmul.f32 0.6931472, %v122_v28 }
  0x25   :  { %v75_v32 = vsel %vm74_vm0, %v72_v24, %v69_v30 }
  0x26   :  { %v84_v33 = vsel %vm83_vm1, %v81_v27, %v78_v31  ;;  %v85_v34 = vadd.f32 %v75_v32, %v57_v26 }
  0x27   :  { %v86_v35 = vadd.f32 %v84_v33, %v58_v29 }
  0x29   :  { %v88_v36 = vadd.f32 %v86_v35, %v85_v34 }
  0x2b   :  { %90 = vst [vmem:[#allocation7] sm:$0xff] %v88_v36 }
  0x2c   :  { %101 = dma.vmem_to_hbm [thread:$0]  %s97_s1, 128, %s99_s23, [#allocation4]  }
  0x2d   :  { %199 = dma.done.wait [#allocation4], 128  }
  0x2e   :  { %200 = vsyncadd [#allocation4], 4294967168 }
  0x2f   :  { %106 = vsyncpa [#allocation3], 1 }
  0x30   :  { %107 = vsyncpa [#allocation6], 1 }
  0x31   :  { %108 = vsyncpa [#allocation4], 1 }

</bundles_post_ra>
